<compile_context>
chip_gen: v7x
topology: tpu7x:2x2x1
jax: 0.10.0
libtpu: 0.0.40
codegen_flags: <defaults>
</compile_context>

<pallas_src>
import functools
import math

import jax
import jax.numpy as jnp
from jax import lax
from jax.experimental import pallas as pl
from jax.experimental.pallas import tpu as pltpu


def _round_up(x, n):
    return ((x + n - 1) // n) * n


def _qp_kernel(*refs, mxu_dtype, activation, approximate, col_tiled):
    if col_tiled:
        (feat_ref, fcol_ref, corr_ref, wr_ref, br_ref, wg_ref, bg_ref,
         out_ref) = refs
    else:
        (feat_ref, corr_ref, wr_ref, br_ref, wg_ref, bg_ref, out_ref) = refs
        fcol_ref = feat_ref

    # Feature rows, upcast to f32 for the elementwise work (v5e-safe).
    f = feat_ref[...].astype(jnp.float32)                    # (TM, H)

    # MLP_R(corr): MXU matmul with bf16 (or f32) operands, f32 accumulation.
    t = jnp.dot(corr_ref[...].astype(mxu_dtype), wr_ref[...],
                preferred_element_type=jnp.float32)
    t = t + br_ref[...].astype(jnp.float32)                  # (TM, TN)

    # MLP_G(feature * feature): square in f32, cast only the MXU operand.
    fsq = (f * f).astype(mxu_dtype)
    f2 = jnp.dot(fsq, wg_ref[...], preferred_element_type=jnp.float32)
    f2 = f2 + bg_ref[...].astype(jnp.float32)                # (TM, TN)

    # Column slice of feature matching the output block (path B) or f itself.
    fc = fcol_ref[...].astype(jnp.float32) if col_tiled else f
    x = fc * t + f2

    if activation == "gelu":
        if approximate:
            y = jax.nn.gelu(x, approximate=True)              # tanh -> EUP slot
        else:
            # Exact erf GELU (matches torch.nn.GELU default).
            y = 0.5 * x * (1.0 + lax.erf(x * (1.0 / math.sqrt(2.0))))
    elif activation == "leaky_relu":
        y = jnp.where(x >= 0, x, 0.01 * x)
    elif activation == "elu":
        y = jnp.where(x >= 0, x, jnp.expm1(jnp.minimum(x, 0.0)))
    else:
        raise ValueError(f"unsupported activation: {activation}")

    # Dropout with p = 0.0 is identity.
    # TODO(synk): dropout with p > 0 would need pltpu.prng_seed/prng_random_bits.
    out_ref[...] = y.astype(out_ref.dtype)


@functools.partial(
    jax.jit,
    static_argnames=("mxu_dtype", "activation", "approximate_gelu",
                     "out_dtype", "col_tile"))
def quadratic_perceptron_pallas(feature, corr, w_r, b_r, w_g, b_g, *,
                                mxu_dtype=jnp.bfloat16,
                                activation="gelu",
                                approximate_gelu=False,
                                out_dtype=None,
                                col_tile=None):
    """feature, corr: (..., H). Returns activation(feature*MLP_R(corr) + MLP_G(feature^2)).

    w_r, w_g are stored pre-transposed as (H_in, H_out). mxu_dtype controls the
    precision of the MXU operands (bf16 default; accumulation is always f32;
    mxu_dtype=f32 is a slow validation mode). out_dtype defaults to the input
    dtype; pass jnp.bfloat16 to cut output HBM traffic. col_tile forces the
    column-tiled (large-H) path with the given output-column tile.
    """
    orig_shape = feature.shape
    h = feature.shape[-1]
    assert corr.shape[-1] == h, "forward requires hidden_in == hidden_out"
    assert w_r.shape == (h, h) and w_g.shape == (h, h)

    feat2d = feature.reshape(-1, h)
    corr2d = corr.reshape(-1, h)
    m = feat2d.shape[0]
    if out_dtype is None:
        out_dtype = feature.dtype

    # Only the small, one-time weight cast happens in the wrapper; activations
    # are passed through untouched (no pad/cast HBM pass).
    wr = w_r.astype(mxu_dtype)
    wg = w_g.astype(mxu_dtype)
    br = b_r.reshape(1, h).astype(jnp.float32)
    bg = b_g.reshape(1, h).astype(jnp.float32)

    feat_bytes = jnp.dtype(feature.dtype).itemsize
    corr_bytes = jnp.dtype(corr.dtype).itemsize
    w_bytes = jnp.dtype(mxu_dtype).itemsize
    o_bytes = jnp.dtype(out_dtype).itemsize

    # Per-chip VMEM budget: ~96 MiB on v5e/v6e (128 MiB physical), ~48 MiB on
    # v7x (64 MiB physical); conservative 48 MiB if the query fails.
    try:
        vmem_cap = int(getattr(pltpu.get_tpu_info(), "vmem_capacity_bytes",
                               64 << 20))
    except Exception:
        vmem_cap = 64 << 20
    vmem_budget = max(32 << 20, (vmem_cap * 3) // 4)

    # --- resident-weight (path A) vs column-tiled (path B) decision ---------
    weight_bytes_each = h * h * w_bytes
    # Constant-index weight blocks never re-fetch; single-buffer them when
    # large so they only occupy VMEM once (biggest win on v7x).
    single_buffer_weights = hasattr(pl, "Buffered") and \
        weight_bytes_each >= (4 << 20)
    wbuf = 1 if single_buffer_weights else 2
    resident_weight_vmem = wbuf * 2 * weight_bytes_each + 2 * 2 * h * 4

    col_tiled = False
    tn = h
    if col_tile is not None:
        assert h % col_tile == 0 and col_tile % 128 == 0, \
            "col_tile must divide H and be a multiple of 128"
        tn = col_tile
        col_tiled = tn < h
    elif resident_weight_vmem > (vmem_budget * 2) // 3 and h % 128 == 0:
        for cand in (512, 256, 128):
            if h % cand == 0 and 2 * 2 * h * cand * w_bytes <= vmem_budget // 3:
                tn = cand
                break
        else:
            tn = 128
        col_tiled = tn < h

    # --- row tile ------------------------------------------------------------
    m8 = _round_up(max(m, 1), 8)
    if col_tiled:
        # Resident per row (double-buffered): full-width feature + corr, plus
        # the column slice of feature and the output columns.
        row_bytes = h * (feat_bytes + corr_bytes) + tn * (feat_bytes + o_bytes)
        weight_block_vmem = 2 * 2 * (h * tn * w_bytes + tn * 4)
        act_budget = vmem_budget - weight_block_vmem - (4 << 20)
    else:
        row_bytes = h * (feat_bytes + corr_bytes + o_bytes)
        act_budget = vmem_budget - resident_weight_vmem - (4 << 20)
    act_budget = max(act_budget, 2 << 20)

    tm = int(act_budget // (2 * max(row_bytes, 1)))     # double-buffered tiles
    tm = min(tm, 4096, m8)
    # Keep >=4 row steps when there is enough data to pipeline / feed both
    # v7x TensorCores; skip for tiny problems where per-step overhead wins.
    if m8 * row_bytes >= (4 << 20):
        tm = min(tm, _round_up(pl.cdiv(m8, 4), 8))
    tm = max(8, (tm // 8) * 8)

    n_row = pl.cdiv(m, tm)                              # ragged last block OK

    kernel = functools.partial(_qp_kernel, mxu_dtype=mxu_dtype,
                               activation=activation,
                               approximate=approximate_gelu,
                               col_tiled=col_tiled)

    if not col_tiled:
        w_kwargs = (dict(pipeline_mode=pl.Buffered(1))
                    if single_buffer_weights else {})
        grid = (n_row,)
        in_specs = [
            pl.BlockSpec((tm, h), lambda i: (i, 0)),               # feature rows
            pl.BlockSpec((tm, h), lambda i: (i, 0)),               # corr rows
            pl.BlockSpec((h, h), lambda i: (0, 0), **w_kwargs),    # W_R resident
            pl.BlockSpec((1, h), lambda i: (0, 0)),                # b_R
            pl.BlockSpec((h, h), lambda i: (0, 0), **w_kwargs),    # W_G resident
            pl.BlockSpec((1, h), lambda i: (0, 0)),                # b_G
        ]
        out_specs = pl.BlockSpec((tm, h), lambda i: (i, 0))
        operands = (feat2d, corr2d, wr, br, wg, bg)
        dim_sem = ("parallel",)
    else:
        n_col = h // tn
        grid = (n_row, n_col)
        in_specs = [
            pl.BlockSpec((tm, h), lambda i, j: (i, 0)),    # full-width feature (f*f)
            pl.BlockSpec((tm, tn), lambda i, j: (i, j)),   # feature columns (f*t)
            pl.BlockSpec((tm, h), lambda i, j: (i, 0)),    # corr rows
            pl.BlockSpec((h, tn), lambda i, j: (0, j)),    # W_R column block
            pl.BlockSpec((1, tn), lambda i, j: (0, j)),    # b_R columns
            pl.BlockSpec((h, tn), lambda i, j: (0, j)),    # W_G column block
            pl.BlockSpec((1, tn), lambda i, j: (0, j)),    # b_G columns
        ]
        out_specs = pl.BlockSpec((tm, tn), lambda i, j: (i, j))
        operands = (feat2d, feat2d, corr2d, wr, br, wg, bg)
        dim_sem = ("parallel", "parallel")

    cost = pl.CostEstimate(
        flops=4 * m * h * h + 10 * m * h,                  # two matmuls + epilogue
        transcendentals=m * h,
        bytes_accessed=(m * h * (feat_bytes + corr_bytes + o_bytes)
                        + (m * h * feat_bytes if col_tiled else 0)
                        + 2 * h * h * w_bytes + 2 * h * 4),
    )

    out = pl.pallas_call(
        kernel,
        out_shape=jax.ShapeDtypeStruct((m, h), out_dtype),
        grid=grid,
        in_specs=in_specs,
        out_specs=out_specs,
        compiler_params=pltpu.CompilerParams(
            dimension_semantics=dim_sem,
            vmem_limit_bytes=int(vmem_budget),
        ),
        cost_estimate=cost,
    )(*operands)

    return out.reshape(orig_shape)


def _init_linear(key, fan_in, fan_out):
    """Mimics torch.nn.Linear default init (uniform +-1/sqrt(fan_in)); weight
    is returned already transposed to (fan_in, fan_out)."""
    kw, kb = jax.random.split(key)
    bound = 1.0 / math.sqrt(fan_in)
    w = jax.random.uniform(kw, (fan_in, fan_out), jnp.float32, -bound, bound)
    b = jax.random.uniform(kb, (fan_out,), jnp.float32, -bound, bound)
    return w, b


def _reference_jax(feature, corr, w_r, b_r, w_g, b_g, approximate=False):
    t = corr @ w_r + b_r
    x = feature * t + (feature * feature) @ w_g + b_g
    if approximate:
        return jax.nn.gelu(x, approximate=True)
    return 0.5 * x * (1.0 + lax.erf(x / jnp.sqrt(2.0)))


if __name__ == "__main__":
    # Forward requires hidden_in == hidden_out (feature multiplies MLP_R's
    # output and is also fed through MLP_G).
    batch, seq, hidden = 2, 8, 32

    key = jax.random.PRNGKey(0)
    k_feat, k_corr, k_r, k_g, k_b = jax.random.split(key, 5)

    feature = jax.random.normal(k_feat, (batch, seq, hidden), jnp.float32)
    corr = jax.random.normal(k_corr, (batch, seq, hidden), jnp.float32)

    w_r, b_r = _init_linear(k_r, hidden, hidden)   # MLP_R
    w_g, b_g = _init_linear(k_g, hidden, hidden)   # MLP_G
    w_b, b_b = _init_linear(k_b, hidden, hidden)   # MLP_B (unused in forward)

    ref = _reference_jax(feature, corr, w_r, b_r, w_g, b_g)

    # 1) f32 MXU operands, exact GELU: structural check against the reference.
    out_f32 = quadratic_perceptron_pallas(feature, corr, w_r, b_r, w_g, b_g,
                                          mxu_dtype=jnp.float32)
    out_f32 = jax.block_until_ready(out_f32)
    assert out_f32.shape == ref.shape == (batch, seq, hidden)
    assert jnp.allclose(out_f32, ref, atol=1e-5, rtol=1e-5), \
        "f32 kernel mismatch vs reference"

    # 2) production path: bf16 MXU operands, f32 accumulation/epilogue,
    #    activations kept f32 in HBM (cast in-kernel), exact GELU.
    out_bf16 = jax.block_until_ready(
        quadratic_perceptron_pallas(feature, corr, w_r, b_r, w_g, b_g))
    assert out_bf16.shape == ref.shape
    assert jnp.allclose(out_bf16, ref, atol=5e-2, rtol=5e-2), \
        "bf16-operand kernel mismatch vs reference"

    # 3) optional tanh-GELU fast path (EUP slot instead of erf polynomial).
    ref_tanh = _reference_jax(feature, corr, w_r, b_r, w_g, b_g,
                              approximate=True)
    out_tanh = jax.block_until_ready(
        quadratic_perceptron_pallas(feature, corr, w_r, b_r, w_g, b_g,
                                    approximate_gelu=True))
    assert jnp.allclose(out_tanh, ref_tanh, atol=5e-2, rtol=5e-2), \
        "tanh-GELU kernel mismatch vs reference"

    # 4) column-tiled (large-H) path exercised at a small shape.
    h2, m2 = 256, 24
    kf2, kc2, kr2, kg2 = jax.random.split(jax.random.PRNGKey(1), 4)
    feat2 = jax.random.normal(kf2, (m2, h2), jnp.float32)
    corr2 = jax.random.normal(kc2, (m2, h2), jnp.float32)
    wr2, br2 = _init_linear(kr2, h2, h2)
    wg2, bg2 = _init_linear(kg2, h2, h2)
    ref2 = _reference_jax(feat2, corr2, wr2, br2, wg2, bg2)
    out2 = jax.block_until_ready(
        quadratic_perceptron_pallas(feat2, corr2, wr2, br2, wg2, bg2,
                                    col_tile=128))
    assert jnp.allclose(out2, ref2, atol=5e-2, rtol=5e-2), \
        "column-tiled kernel mismatch vs reference"

    print("KERNEL_OK")
</pallas_src>

<mosaic_0001>
module attributes {stable_mosaic.version = 11 : i64} {
  func.func @_qp_kernel(%arg0: i32, %arg1: memref<16x32xf32, #tpu.memory_space<vmem>>, %arg2: memref<16x32xf32, #tpu.memory_space<vmem>>, %arg3: memref<32x32xf32, #tpu.memory_space<vmem>>, %arg4: memref<1x32xf32, #tpu.memory_space<vmem>>, %arg5: memref<32x32xf32, #tpu.memory_space<vmem>>, %arg6: memref<1x32xf32, #tpu.memory_space<vmem>>, %arg7: memref<16x32xf32, #tpu.memory_space<vmem>>) attributes {dimension_semantics = [#tpu.dimension_semantics<parallel>], iteration_bounds = array<i64: 1>, scalar_prefetch = 0 : i64, scratch_operands = 0 : i64, tpu.core_type = #tpu.core_type<tc>, window_params = [{transform_indices = @transform_0, window_bounds = array<i64: 16, 32>}, {transform_indices = @transform_1, window_bounds = array<i64: 16, 32>}, {pipeline_mode = #tpu.pipeline_mode<synchronous>, transform_indices = @transform_2, window_bounds = array<i64: 32, 32>}, {pipeline_mode = #tpu.pipeline_mode<synchronous>, transform_indices = @transform_3, window_bounds = array<i64: 1, 32>}, {pipeline_mode = #tpu.pipeline_mode<synchronous>, transform_indices = @transform_4, window_bounds = array<i64: 32, 32>}, {pipeline_mode = #tpu.pipeline_mode<synchronous>, transform_indices = @transform_5, window_bounds = array<i64: 1, 32>}, {transform_indices = @transform_6, window_bounds = array<i64: 16, 32>}]} {
    %c0 = arith.constant 0 : index
    %c0_0 = arith.constant 0 : index
    %0 = vector.load %arg1[%c0, %c0_0] : memref<16x32xf32, #tpu.memory_space<vmem>>, vector<16x32xf32>
    %c0_1 = arith.constant 0 : index
    %c0_2 = arith.constant 0 : index
    %1 = vector.load %arg2[%c0_1, %c0_2] : memref<16x32xf32, #tpu.memory_space<vmem>>, vector<16x32xf32>
    %c0_3 = arith.constant 0 : index
    %c0_4 = arith.constant 0 : index
    %2 = vector.load %arg3[%c0_3, %c0_4] : memref<32x32xf32, #tpu.memory_space<vmem>>, vector<32x32xf32>
    %cst = arith.constant dense<0.000000e+00> : vector<16x32xf32>
    %3 = tpu.matmul %1, %2, %cst {dimension_numbers = #tpu.dot_dimension_numbers<[1], [0], [0], [1], [0, 0, 1, 1], [], []>} : vector<16x32xf32>, vector<32x32xf32>, vector<16x32xf32> -> vector<16x32xf32>
    %c0_5 = arith.constant 0 : index
    %c0_6 = arith.constant 0 : index
    %4 = vector.load %arg4[%c0_5, %c0_6] : memref<1x32xf32, #tpu.memory_space<vmem>>, vector<1x32xf32>
    %5 = vector.broadcast %4 : vector<1x32xf32> to vector<16x32xf32>
    %6 = arith.addf %3, %5 : vector<16x32xf32>
    %7 = arith.mulf %0, %0 : vector<16x32xf32>
    %c0_7 = arith.constant 0 : index
    %c0_8 = arith.constant 0 : index
    %8 = vector.load %arg5[%c0_7, %c0_8] : memref<32x32xf32, #tpu.memory_space<vmem>>, vector<32x32xf32>
    %cst_9 = arith.constant dense<0.000000e+00> : vector<16x32xf32>
    %9 = tpu.matmul %7, %8, %cst_9 {dimension_numbers = #tpu.dot_dimension_numbers<[1], [0], [0], [1], [0, 0, 1, 1], [], []>} : vector<16x32xf32>, vector<32x32xf32>, vector<16x32xf32> -> vector<16x32xf32>
    %c0_10 = arith.constant 0 : index
    %c0_11 = arith.constant 0 : index
    %10 = vector.load %arg6[%c0_10, %c0_11] : memref<1x32xf32, #tpu.memory_space<vmem>>, vector<1x32xf32>
    %11 = vector.broadcast %10 : vector<1x32xf32> to vector<16x32xf32>
    %12 = arith.addf %9, %11 : vector<16x32xf32>
    %13 = arith.mulf %0, %6 : vector<16x32xf32>
    %14 = arith.addf %13, %12 : vector<16x32xf32>
    %cst_12 = arith.constant 5.000000e-01 : f32
    %15 = vector.broadcast %cst_12 : f32 to vector<16x32xf32>
    %16 = arith.mulf %15, %14 : vector<16x32xf32>
    %cst_13 = arith.constant 0.707106769 : f32
    %17 = vector.broadcast %cst_13 : f32 to vector<16x32xf32>
    %18 = arith.mulf %14, %17 : vector<16x32xf32>
    %19 = math.erf %18 : vector<16x32xf32>
    %cst_14 = arith.constant 1.000000e+00 : f32
    %20 = vector.broadcast %cst_14 : f32 to vector<16x32xf32>
    %21 = arith.addf %20, %19 : vector<16x32xf32>
    %22 = arith.mulf %16, %21 : vector<16x32xf32>
    %c0_15 = arith.constant 0 : index
    %c0_16 = arith.constant 0 : index
    %23 = vector.load %arg7[%c0_15, %c0_16] : memref<16x32xf32, #tpu.memory_space<vmem>>, vector<16x32xf32>
    tpu.vector_store %arg7[%c0_15, %c0_16], %22 {strides = array<i32>} : memref<16x32xf32, #tpu.memory_space<vmem>>, vector<16x32xf32>,
    return
  }
  func.func @transform_0(%arg0: i32) -> (i32, i32) {
    %c0_i32 = arith.constant 0 : i32
    %c0_i32_0 = arith.constant 0 : i32
    return %arg0, %c0_i32 : i32, i32
  }
  func.func @transform_1(%arg0: i32) -> (i32, i32) {
    %c0_i32 = arith.constant 0 : i32
    %c0_i32_0 = arith.constant 0 : i32
    return %arg0, %c0_i32 : i32, i32
  }
  func.func @transform_2(%arg0: i32) -> (i32, i32) {
    %c0_i32 = arith.constant 0 : i32
    %c0_i32_0 = arith.constant 0 : i32
    %c0_i32_1 = arith.constant 0 : i32
    return %c0_i32, %c0_i32_0 : i32, i32
  }
  func.func @transform_3(%arg0: i32) -> (i32, i32) {
    %c0_i32 = arith.constant 0 : i32
    %c0_i32_0 = arith.constant 0 : i32
    %c0_i32_1 = arith.constant 0 : i32
    return %c0_i32, %c0_i32_0 : i32, i32
  }
  func.func @transform_4(%arg0: i32) -> (i32, i32) {
    %c0_i32 = arith.constant 0 : i32
    %c0_i32_0 = arith.constant 0 : i32
    %c0_i32_1 = arith.constant 0 : i32
    return %c0_i32, %c0_i32_0 : i32, i32
  }
  func.func @transform_5(%arg0: i32) -> (i32, i32) {
    %c0_i32 = arith.constant 0 : i32
    %c0_i32_0 = arith.constant 0 : i32
    %c0_i32_1 = arith.constant 0 : i32
    return %c0_i32, %c0_i32_0 : i32, i32
  }
  func.func @transform_6(%arg0: i32) -> (i32, i32) {
    %c0_i32 = arith.constant 0 : i32
    %c0_i32_0 = arith.constant 0 : i32
    return %arg0, %c0_i32 : i32, i32
  }
}

</mosaic_0001>

<bundles_post_ra>
// kernel: quadratic_perceptron_pallas.1
= control target key start
LH: loop header
LB: loop body
LE: loop exit
PB: predicated region body
PF: predicated region fallthrough
CT: control target
= control target key end

     0   :  { %11 = vsyncpa [#allocation3], 0  ;;  %s576_s0 = inlined_call_operand.hbm [shape: f32[16,32], index: 0, kind: input, shape index: {}]   ;;  %s577_s1 = inlined_call_operand.vmem [shape: f32[16,32], index: 1, kind: input, shape index: {}]   ;;  %s578_s2 = inlined_call_operand.hbm [shape: f32[32,32], index: 2, kind: input, shape index: {}]   ;;  %s579_s3 = inlined_call_operand.vmem [shape: f32[1,32], index: 3, kind: input, shape index: {}]   ;;  %s580_s4 = inlined_call_operand.hbm [shape: f32[32,32], index: 4, kind: input, shape index: {}]   ;;  %s581_s5 = inlined_call_operand.vmem [shape: f32[1,32], index: 5, kind: input, shape index: {}]   ;;  %s582_s6 = inlined_call_operand.hbm [shape: f32[16,32], index: 6, kind: output, shape index: {}]  }
   0x1   :  { %12 = vsyncpa [#allocation6], 0 }
   0x2   :  { %13 = vsyncpa [#allocation4], 0  ;;  %s450_s21 = smov [#allocation5]   ;;  %s451_s23 = smov [#allocation2]  }
   0x3   :  { %s33_s22 = sshll.u32 %s450_s21, 4  ;;  %s19_s24 = sshll.u32 %s451_s23, 4  ;;  %s34_s22 = int_to_ptr.vmem [resolvable:$true] %s33_s22  ;;  %s491_s24 = int_to_ptr.vmem [resolvable:$true] %s19_s24 }
   0x4   :  { %s356_s27 = scalar_lea.hbm %s578_s2, 512 }
   0x5   :  { %p357_p0 = scmp.ne.s32.totalorder %s578_s2, %s356_s27  ;;  %p360_p1 = scmp.lt.u32.totalorder %s356_s27, %s578_s2 }
   0x7   :  { %p362_p2 = pnand %p360_p1, %p357_p0 }
   0x9   :  { %365 = shalt.err (!%p362_p2)
}
   0xa   :  { %s366_s8 = scalar_lea.vmem %s34_s22, 512  ;;  %p371_p4 = scmp.lt.s32.totalorder %s34_s22, %s34_s22 }
   0xb   :  { %p367_p3 = scmp.ne.s32.totalorder %s34_s22, %s366_s8  ;;  %p372_p5 = scmp.lt.s32.totalorder %s366_s8, %s366_s8 }
   0xd   :  { %p373_p6 = por %p372_p5, %p371_p4 }
   0xf   :  { %p374_p7 = pnand %p373_p6, %p367_p3 }
  0x11   :  { %377 = shalt.err (!%p374_p7)
}
  0x12   :  { %s452_s9 = smov 128   ;;  %s453_s10 = smov 8  }
  0x13   :  { %39 = dma.hbm_to_vmem [thread:$0]  %s578_s2, 512, %s34_s22, [#allocation6], %s452_s9, %s452_s9, %s453_s10  }
  0x14   :  { %s378_s15 = scalar_lea.hbm %s576_s0, 256 }
  0x15   :  { %p379_p8 = scmp.ne.s32.totalorder %s576_s0, %s378_s15  ;;  %p382_p9 = scmp.lt.u32.totalorder %s378_s15, %s576_s0 }
  0x17   :  { %p384_p10 = pnand %p382_p9, %p379_p8 }
  0x19   :  { %387 = shalt.err (!%p384_p10)
}
  0x1a   :  { %s388_s20 = scalar_lea.vmem %s491_s24, 256  ;;  %p393_p12 = scmp.lt.s32.totalorder %s491_s24, %s491_s24 }
  0x1b   :  { %p389_p11 = scmp.ne.s32.totalorder %s491_s24, %s388_s20  ;;  %p394_p13 = scmp.lt.s32.totalorder %s388_s20, %s388_s20 }
  0x1d   :  { %p395_p0 = por %p394_p13, %p393_p12 }
  0x1f   :  { %p396_p1 = pnand %p395_p0, %p389_p11 }
  0x21   :  { %399 = shalt.err (!%p396_p1)
}
  0x22   :  { %25 = dma.hbm_to_vmem [thread:$0]  %s576_s0, 256, %s491_s24, [#allocation3], %s452_s9, %s452_s9, %s453_s10  }
  0x23   :  { %s454_s22 = smov [#allocation7]   ;;  %s400_s27 = scalar_lea.hbm %s580_s4, 512 }
  0x24   :  { %s47_s23 = sshll.u32 %s454_s22, 4  ;;  %p401_p2 = scmp.ne.s32.totalorder %s580_s4, %s400_s27  ;;  %s48_s23 = int_to_ptr.vmem [resolvable:$true] %s47_s23 }
  0x25   :  { %p404_p3 = scmp.lt.u32.totalorder %s400_s27, %s580_s4 }
  0x27   :  { %p406_p4 = pnand %p404_p3, %p401_p2 }
  0x29   :  { %409 = shalt.err (!%p406_p4)
}
  0x2a   :  { %s410_s8 = scalar_lea.vmem %s48_s23, 512  ;;  %p415_p6 = scmp.lt.s32.totalorder %s48_s23, %s48_s23 }
  0x2b   :  { %p411_p5 = scmp.ne.s32.totalorder %s48_s23, %s410_s8  ;;  %p416_p7 = scmp.lt.s32.totalorder %s410_s8, %s410_s8 }
  0x2d   :  { %p417_p8 = por %p416_p7, %p415_p6 }
  0x2f   :  { %p418_p9 = pnand %p417_p8, %p411_p5 }
  0x31   :  { %421 = shalt.err (!%p418_p9)
}
  0x32   :  { %53 = dma.hbm_to_vmem [thread:$0]  %s580_s4, 512, %s48_s23, [#allocation6], %s452_s9, %s452_s9, %s453_s10  }
  0x33   :  { %444 = dma.done.wait [#allocation3], 256  }
  0x34   :  { %445 = vsyncadd [#allocation3], 4294967040 }
  0x35   :  { %446 = dma.done.wait [#allocation6], 1024  }
  0x36   :  { %447 = vsyncadd [#allocation6], 4294966272  ;;  %v69_v0 = vld [vmem:[#allocation5] sm:$0xff]  ;;  %v70_v1 = vld [vmem:[#allocation5 + $0x8] sm:$0xff]  ;;  %vm80_vm0 = vcmask 261120  }
  0x37   :  { %v164_v2 = vld [vmem:[#allocation7] sm:$0xff]  ;;  %v330_v3 = vpack.c.bf16 %v70_v1, %v69_v0  ;;  %v165_v4 = vld [vmem:[#allocation7 + $0x8] sm:$0xff]  ;;  %v71_v5 = vld [vmem:[#allocation5 + $0x10] sm:$0xff] }
  0x38   :  { %v72_v6 = vld [vmem:[#allocation5 + $0x18] sm:$0xff]  ;;  %v338_v7 = vpack.c.bf16 %v165_v4, %v164_v2  ;;  %v166_v9 = vld [vmem:[#allocation7 + $0x10] sm:$0xff] }
  0x39   :  { %v334_v8 = vpack.c.bf16 %v72_v6, %v71_v5  ;;  %v167_v10 = vld [vmem:[#allocation7 + $0x18] sm:$0xff]  ;;  %v67_v11 = vld [vmem:[%s577_s1] sm:$0xff]  ;;  %331 = vmatprep.subr.bf16.mxu0 %v330_v3 }
  0x3a   :  { %v342_v12 = vpack.c.bf16 %v167_v10, %v166_v9  ;;  %316 = vmatprep.mubr.msk.f32.mxu0 %vm80_vm0, %v67_v11  ;;  %v65_v13 = vld [vmem:[#allocation2] sm:$0xff]  ;;  %333 = vmatpush3.bf16.msra.mxu0 %v330_v3  ;;  %v66_v15 = vld [vmem:[#allocation2 + $0x8] sm:$0xff] }
  0x3b   :  { %339 = vmatprep.subr.bf16.mxu1 %v338_v7  ;;  %v162_v14 = vmul.f32 %v65_v13, %v65_v13  ;;  %335 = vmatprep.subr.bf16.mxu0 %v334_v8  ;;  %v68_v16 = vld [vmem:[%s577_s1 + $0x8] sm:$0xff]  ;;  %v163_v17 = vmul.f32 %v66_v15, %v66_v15  ;;  %v290_v18 = vld [vmem:[%s579_s3] ss:$0 sm:$0xff]  ;;  %s455_s1 = smov [#allocation8]  }
  0x3c   :  { %341 = vmatpush3.bf16.msra.mxu1 %v338_v7  ;;  %v293_v19 = vld [vmem:[%s581_s5] ss:$0 sm:$0xff]  ;;  %s277_s3 = sshll.u32 %s455_s1, 4  ;;  %s278_s3 = int_to_ptr.vmem [resolvable:$true] %s277_s3 }
  0x3d   :  { %343 = vmatprep.subr.bf16.mxu1 %v342_v12  ;;  %327 = vmatprep.mubr.msk.f32.mxu1 %vm80_vm0, %v162_v14  ;;  %s422_s5 = scalar_lea.vmem %s278_s3, 256  ;;  %p427_p11 = scmp.lt.s32.totalorder %s278_s3, %s278_s3 }
  0x3e   :  { %337 = vmatpush3.bf16.msra.mxu0 %v334_v8  ;;  %p423_p10 = scmp.ne.s32.totalorder %s278_s3, %s422_s5  ;;  %p428_p12 = scmp.lt.s32.totalorder %s422_s5, %s422_s5 }
  0x40   :  { %345 = vmatpush3.bf16.msra.mxu1 %v342_v12  ;;  %p429_p13 = por %p428_p12, %p427_p11 }
  0x41   :  { %317 = vmatmul.mubr.msk.f32.vlgmr.msra.gmra.mrb[0].mxu0 %vm80_vm0, %v68_v16 }
  0x42   :  { %p430_p0 = pnand %p429_p13, %p423_p10 }
  0x43   :  { %328 = vmatmul.mubr.msk.f32.vlgmr.msra.gmra.mrb[0].mxu1 %vm80_vm0, %v163_v17 }
 0x114   :  { %v318_v20 = vpop.f32.mrb[0].mxu0 }
 0x115   :  { %v159_v21 = vadd.f32 %v318_v20, %v290_v18  ;;  %v153_v22 = vpop.f32.mrb[1].mxu0 }
 0x116   :  { %v329_v23 = vpop.f32.mrb[0].mxu1  ;;  %v154_v24 = vadd.f32 %v290_v18, %v153_v22 }
 0x117   :  { %v253_v25 = vadd.f32 %v329_v23, %v293_v19  ;;  %v247_v26 = vpop.f32.mrb[1].mxu1  ;;  %v257_v27 = vmul.f32 %v159_v21, %v66_v15 }
 0x118   :  { %v248_v28 = vadd.f32 %v293_v19, %v247_v26  ;;  %v256_v29 = vmul.f32 %v154_v24, %v65_v13 }
 0x119   :  { %v259_v30 = vadd.f32 %v257_v27, %v253_v25 }
 0x11a   :  { %v258_v31 = vadd.f32 %v256_v29, %v248_v28 }
 0x11b   :  { %v263_v32 = vmul.f32 0.70710677, %v259_v30  ;;  %v261_v36 = vmul.f32 0.5, %v259_v30 }
 0x11c   :  { %v262_v33 = vmul.f32 0.70710677, %v258_v31  ;;  %v260_v38 = vmul.f32 0.5, %v258_v31 }
 0x11d   :  { %352 = verf.f32 %v263_v32 }
 0x11e   :  { %354 = verf.f32 %v262_v33 }
 0x127   :  { %v353_v34 = vpop.eup %352 }
 0x128   :  { %v355_v35 = vpop.eup %354  ;;  %v267_v37 = vadd.f32 1.0, %v353_v34 }
 0x129   :  { %v266_v39 = vadd.f32 1.0, %v355_v35 }
 0x12a   :  { %v269_v40 = vmul.f32 %v267_v37, %v261_v36 }
 0x12b   :  { %v268_v41 = vmul.f32 %v266_v39, %v260_v38 }
 0x12c   :  { %271 = vst.msk [vmem:[#allocation8 + $0x8] sm:$0xff] %vm80_vm0, %v269_v40 }
 0x12d   :  { %270 = vst.msk [vmem:[#allocation8] sm:$0xff] %vm80_vm0, %v268_v41 }
 0x12e   :  { %433 = shalt.err (!%p430_p0)
}
 0x12f   :  { %s434_s20 = scalar_lea.hbm %s582_s6, 256 }
 0x130   :  { %p435_p1 = scmp.ne.s32.totalorder %s582_s6, %s434_s20  ;;  %p438_p2 = scmp.lt.u32.totalorder %s434_s20, %s582_s6 }
 0x132   :  { %p440_p3 = pnand %p438_p2, %p435_p1 }
 0x134   :  { %443 = shalt.err (!%p440_p3)
}
 0x135   :  { %283 = dma.vmem_to_hbm [thread:$0]  %s278_s3, 256, %s582_s6, [#allocation4], %s452_s9, %s452_s9, %s453_s10  }
 0x136   :  { %448 = dma.done.wait [#allocation4], 256  }
 0x137   :  { %449 = vsyncadd [#allocation4], 4294967040 }
 0x138   :  { %287 = vsyncpa [#allocation3], 1 }
 0x139   :  { %288 = vsyncpa [#allocation6], 1 }
 0x13a   :  { %289 = vsyncpa [#allocation4], 1 }

</bundles_post_ra>
